<compile_context>
chip_gen: v7x
topology: tpu7x:2x2x1
jax: 0.10.0
libtpu: 0.0.40
codegen_flags: <defaults>
</compile_context>

<pallas_src>
import math

import jax
import jax.numpy as jnp
from jax.experimental import pallas as pl
from jax.experimental.pallas import tpu as pltpu

_LANES = 1024          # lane-dense slab width (multiple of 128)
_MAX_TILE_ROWS = 512   # 512 x 1024 x 4 B = 2 MiB per block per array (f32)


def _avg_pool_kernel(x_ref, y_ref, o_ref):
    # Mean over the stacked dim == (x + y) * 0.5 — two VPU ops per vreg.
    o_ref[...] = (x_ref[...] + y_ref[...]) * 0.5


def average_pooling(x, y):
    """Pallas equivalent of AveragePooling.forward(x, y)."""
    assert x.shape == y.shape, "x and y must have identical shapes"
    assert x.dtype == y.dtype
    orig_shape = x.shape

    total = int(math.prod(orig_shape)) if len(orig_shape) > 0 else 1
    if total == 0:
        # Degenerate empty tensor: nothing to compute.
        return jnp.zeros(orig_shape, dtype=x.dtype)

    # Flatten, pad (at most _LANES - 1 elements) to a lane-dense slab.
    padded_total = pl.cdiv(total, _LANES) * _LANES
    rows = padded_total // _LANES

    x_flat = x.reshape(total)
    y_flat = y.reshape(total)
    if padded_total != total:
        pad = padded_total - total
        x_flat = jnp.pad(x_flat, (0, pad))
        y_flat = jnp.pad(y_flat, (0, pad))

    x2 = x_flat.reshape(rows, _LANES)
    y2 = y_flat.reshape(rows, _LANES)

    # Tile rows: full extent for small inputs (block == array dim is always
    # legal), otherwise 8-aligned big tiles; edge blocks are masked by Pallas.
    if rows <= _MAX_TILE_ROWS:
        tile_r = rows
    else:
        tile_r = _MAX_TILE_ROWS  # multiple of 8 -> sublane aligned

    grid = (pl.cdiv(rows, tile_r),)

    out2 = pl.pallas_call(
        _avg_pool_kernel,
        out_shape=jax.ShapeDtypeStruct((rows, _LANES), x.dtype),
        grid_spec=pl.GridSpec(
            grid=grid,
            in_specs=[
                pl.BlockSpec((tile_r, _LANES), lambda i: (i, 0)),
                pl.BlockSpec((tile_r, _LANES), lambda i: (i, 0)),
            ],
            out_specs=pl.BlockSpec((tile_r, _LANES), lambda i: (i, 0)),
        ),
        compiler_params=pltpu.CompilerParams(
            # Independent row tiles: let v7x shard them across both TCs.
            dimension_semantics=("parallel",),
        ),
    )(x2, y2)

    out_flat = out2.reshape(padded_total)
    if padded_total != total:
        out_flat = out_flat[:total]
    return out_flat.reshape(orig_shape)


if __name__ == "__main__":
    key = jax.random.PRNGKey(0)
    kx, ky = jax.random.split(key)

    # Small NCHW shapes consistent with the module's usage.
    x = jax.random.normal(kx, (2, 4, 16, 16), dtype=jnp.float32)
    y = jax.random.normal(ky, (2, 4, 16, 16), dtype=jnp.float32)

    out = average_pooling(x, y)
    out = jax.block_until_ready(out)

    # Reference check: mean over stacked dim == (x + y) / 2
    ref = jnp.mean(jnp.stack([x, y], axis=1), axis=1)
    assert out.shape == x.shape
    assert jnp.allclose(out, ref, atol=1e-6, rtol=1e-6)

    print("KERNEL_OK")
</pallas_src>

<mosaic_0001>
module attributes {stable_mosaic.version = 11 : i64} {
  func.func @_avg_pool_kernel(%arg0: i32, %arg1: memref<2x1024xf32, #tpu.memory_space<vmem>>, %arg2: memref<2x1024xf32, #tpu.memory_space<vmem>>, %arg3: memref<2x1024xf32, #tpu.memory_space<vmem>>) attributes {dimension_semantics = [#tpu.dimension_semantics<parallel>], iteration_bounds = array<i64: 1>, scalar_prefetch = 0 : i64, scratch_operands = 0 : i64, tpu.core_type = #tpu.core_type<tc>, window_params = [{transform_indices = @transform_0, window_bounds = array<i64: 2, 1024>}, {transform_indices = @transform_1, window_bounds = array<i64: 2, 1024>}, {transform_indices = @transform_2, window_bounds = array<i64: 2, 1024>}]} {
    %c0 = arith.constant 0 : index
    %c0_0 = arith.constant 0 : index
    %0 = vector.load %arg1[%c0, %c0_0] : memref<2x1024xf32, #tpu.memory_space<vmem>>, vector<2x1024xf32>
    %c0_1 = arith.constant 0 : index
    %c0_2 = arith.constant 0 : index
    %1 = vector.load %arg2[%c0_1, %c0_2] : memref<2x1024xf32, #tpu.memory_space<vmem>>, vector<2x1024xf32>
    %2 = arith.addf %0, %1 : vector<2x1024xf32>
    %cst = arith.constant 5.000000e-01 : f32
    %3 = vector.broadcast %cst : f32 to vector<2x1024xf32>
    %4 = arith.mulf %2, %3 : vector<2x1024xf32>
    %c0_3 = arith.constant 0 : index
    %c0_4 = arith.constant 0 : index
    %5 = vector.load %arg3[%c0_3, %c0_4] : memref<2x1024xf32, #tpu.memory_space<vmem>>, vector<2x1024xf32>
    tpu.vector_store %arg3[%c0_3, %c0_4], %4 {strides = array<i32>} : memref<2x1024xf32, #tpu.memory_space<vmem>>, vector<2x1024xf32>,
    return
  }
  func.func @transform_0(%arg0: i32) -> (i32, i32) {
    %c0_i32 = arith.constant 0 : i32
    %c0_i32_0 = arith.constant 0 : i32
    return %arg0, %c0_i32 : i32, i32
  }
  func.func @transform_1(%arg0: i32) -> (i32, i32) {
    %c0_i32 = arith.constant 0 : i32
    %c0_i32_0 = arith.constant 0 : i32
    return %arg0, %c0_i32 : i32, i32
  }
  func.func @transform_2(%arg0: i32) -> (i32, i32) {
    %c0_i32 = arith.constant 0 : i32
    %c0_i32_0 = arith.constant 0 : i32
    return %arg0, %c0_i32 : i32, i32
  }
}

</mosaic_0001>

<bundles_post_ra>
// kernel: tpu_custom_call.1
= control target key start
LH: loop header
LB: loop body
LE: loop exit
PB: predicated region body
PF: predicated region fallthrough
CT: control target
= control target key end

     0   :  { %7 = vsyncpa [#allocation3], 0  ;;  %s191_s0 = inlined_call_operand.hbm [shape: f32[2,1024], index: 0, kind: input, shape index: {}]   ;;  %s192_s1 = inlined_call_operand.hbm [shape: f32[2,1024], index: 1, kind: input, shape index: {}]   ;;  %s193_s2 = inlined_call_operand.hbm [shape: f32[2,1024], index: 2, kind: output, shape index: {}]  }
   0x1   :  { %8 = vsyncpa [#allocation6], 0 }
   0x2   :  { %9 = vsyncpa [#allocation4], 0  ;;  %s137_s9 = smov [#allocation2]   ;;  %s138_s11 = smov [#allocation5]  }
   0x3   :  { %s16_s10 = sshll.u32 %s137_s9, 4  ;;  %s26_s12 = sshll.u32 %s138_s11, 4  ;;  %s17_s10 = int_to_ptr.vmem [resolvable:$true] %s16_s10  ;;  %s27_s12 = int_to_ptr.vmem [resolvable:$true] %s26_s12 }
   0x4   :  { %s65_s15 = scalar_lea.hbm %s191_s0, 256 }
   0x5   :  { %p66_p0 = scmp.ne.s32.totalorder %s191_s0, %s65_s15  ;;  %p69_p1 = scmp.lt.u32.totalorder %s65_s15, %s191_s0 }
   0x7   :  { %p71_p2 = pnand %p69_p1, %p66_p0 }
   0x9   :  { %74 = shalt.err (!%p71_p2)
}
   0xa   :  { %s75_s20 = scalar_lea.vmem %s17_s10, 256  ;;  %p80_p4 = scmp.lt.s32.totalorder %s17_s10, %s17_s10 }
   0xb   :  { %p76_p3 = scmp.ne.s32.totalorder %s17_s10, %s75_s20  ;;  %p81_p5 = scmp.lt.s32.totalorder %s75_s20, %s75_s20 }
   0xd   :  { %p82_p6 = por %p81_p5, %p80_p4 }
   0xf   :  { %p83_p7 = pnand %p82_p6, %p76_p3 }
  0x11   :  { %86 = shalt.err (!%p83_p7)
}
  0x12   :  { %19 = dma.hbm_to_vmem [thread:$0]  %s191_s0, 256, %s17_s10, [#allocation3]  }
  0x13   :  { %s87_s25 = scalar_lea.hbm %s192_s1, 256 }
  0x14   :  { %p88_p8 = scmp.ne.s32.totalorder %s192_s1, %s87_s25  ;;  %p91_p9 = scmp.lt.u32.totalorder %s87_s25, %s192_s1 }
  0x16   :  { %p93_p10 = pnand %p91_p9, %p88_p8 }
  0x18   :  { %96 = shalt.err (!%p93_p10)
}
  0x19   :  { %s97_s30 = scalar_lea.vmem %s27_s12, 256  ;;  %p102_p12 = scmp.lt.s32.totalorder %s27_s12, %s27_s12 }
  0x1a   :  { %p98_p11 = scmp.ne.s32.totalorder %s27_s12, %s97_s30  ;;  %p103_p13 = scmp.lt.s32.totalorder %s97_s30, %s97_s30 }
  0x1c   :  { %p104_p0 = por %p103_p13, %p102_p12 }
  0x1e   :  { %p105_p1 = pnand %p104_p0, %p98_p11 }
  0x20   :  { %108 = shalt.err (!%p105_p1)
}
  0x21   :  { %29 = dma.hbm_to_vmem [thread:$0]  %s192_s1, 256, %s27_s12, [#allocation6]  }
  0x22   :  { %131 = dma.done.wait [#allocation3], 256  }
  0x23   :  { %132 = vsyncadd [#allocation3], 4294967040 }
  0x24   :  { %133 = dma.done.wait [#allocation6], 256  }
  0x25   :  { %134 = vsyncadd [#allocation6], 4294967040  ;;  %v36_v0 = vld [vmem:[#allocation2] sm:$0xff]  ;;  %v38_v1 = vld [vmem:[#allocation5] sm:$0xff]  ;;  %s139_s4 = smov [#allocation7]  }
  0x26   :  { %v37_v2 = vld [vmem:[#allocation2 + $0x8] sm:$0xff]  ;;  %v40_v3 = vadd.f32 %v38_v1, %v36_v0  ;;  %v39_v4 = vld [vmem:[#allocation5 + $0x8] sm:$0xff]  ;;  %s52_s5 = sshll.u32 %s139_s4, 4  ;;  %s53_s5 = int_to_ptr.vmem [resolvable:$true] %s52_s5 }
  0x27   :  { %v41_v5 = vadd.f32 %v39_v4, %v37_v2  ;;  %s109_s6 = scalar_lea.vmem %s53_s5, 256  ;;  %p114_p3 = scmp.lt.s32.totalorder %s53_s5, %s53_s5 }
  0x28   :  { %v42_v6 = vmul.f32 0.5, %v40_v3  ;;  %p110_p2 = scmp.ne.s32.totalorder %s53_s5, %s109_s6  ;;  %p115_p4 = scmp.lt.s32.totalorder %s109_s6, %s109_s6 }
  0x29   :  { %v43_v7 = vmul.f32 0.5, %v41_v5 }
  0x2a   :  { %44 = vst [vmem:[#allocation7] sm:$0xff] %v42_v6  ;;  %p116_p5 = por %p115_p4, %p114_p3 }
  0x2b   :  { %45 = vst [vmem:[#allocation7 + $0x8] sm:$0xff] %v43_v7 }
  0x2c   :  { %p117_p6 = pnand %p116_p5, %p110_p2 }
  0x2e   :  { %120 = shalt.err (!%p117_p6)
}
  0x2f   :  { %s121_s8 = scalar_lea.hbm %s193_s2, 256 }
  0x30   :  { %p122_p7 = scmp.ne.s32.totalorder %s193_s2, %s121_s8  ;;  %p125_p8 = scmp.lt.u32.totalorder %s121_s8, %s193_s2 }
  0x32   :  { %p127_p9 = pnand %p125_p8, %p122_p7 }
  0x34   :  { %130 = shalt.err (!%p127_p9)
}
  0x35   :  { %55 = dma.vmem_to_hbm [thread:$0]  %s53_s5, 256, %s193_s2, [#allocation4]  }
  0x36   :  { %135 = dma.done.wait [#allocation4], 256  }
  0x37   :  { %136 = vsyncadd [#allocation4], 4294967040 }
  0x38   :  { %59 = vsyncpa [#allocation3], 1 }
  0x39   :  { %60 = vsyncpa [#allocation6], 1 }
  0x3a   :  { %61 = vsyncpa [#allocation4], 1 }

</bundles_post_ra>
